<compile_context>
chip_gen: v7x
topology: tpu7x:2x2x1
jax: 0.10.0
libtpu: 0.0.40
codegen_flags: <defaults>
</compile_context>

<pallas_src>
import jax
import jax.numpy as jnp
from jax.experimental import pallas as pl
from jax.experimental.pallas import tpu as pltpu


def _round_up(n: int, m: int) -> int:
    return ((n + m - 1) // m) * m


def _pick_tm(M: int) -> int:
    """Rows of patches per grid step.

    Goals (perf review): >= 2 grid steps whenever M allows (so the 'parallel'
    axis shards across v7x's 2 TensorCores), TM | M (no clipped/masked last
    block), TM <= 1024 so double-buffered bf16 in/out tiles fit v5e's 16 MiB
    scoped-VMEM default with the weight resident.
    """
    cap = 1024
    if M <= cap:
        half = M // 2
        if half >= 8 and half % 8 == 0:
            return half          # grid = 2, both blocks full-size
        return M                 # full-extent single block (always legal)
    # Large M: biggest multiple of 8 <= cap that divides M exactly.
    for tm in range(cap, 7, -8):
        if M % tm == 0:
            return tm
    return cap                   # fallback: last block clipped (still correct)


def _patch_embed_kernel(x_ref, w_ref, b_ref, o_ref):
    # x_ref: (TM, Kpad) bf16 patch rows; w_ref: (Kpad, Epad) bf16;
    # b_ref: (1, Epad) f32.  MXU matmul with f32 accumulation, f32 bias add.
    acc = jnp.dot(x_ref[...], w_ref[...], preferred_element_type=jnp.float32)
    o_ref[...] = (acc + b_ref[...]).astype(o_ref.dtype)


def patch_embedding(x_nchw, weight, bias, patch_size: int, *,
                    out_dtype=jnp.bfloat16, channels_last: bool = False):
    """x_nchw: (B, C, H, W); weight: (E, C, P, P); bias: (E,).

    Returns (B, E, H/P, W/P) (NCHW, torch-module parity) or, with
    channels_last=True, (B, Hp*Wp, E) with no extra output transpose pass.
    """
    B, C, H, W = x_nchw.shape
    E = weight.shape[0]
    P = patch_size
    assert H % P == 0 and W % P == 0
    Hp, Wp = H // P, W // P
    M = B * Hp * Wp
    K = C * P * P
    # MXU-shape alignment: only pad K when already in the compute-bound regime
    # (K >= 256); pad E to 256 for large E, else 128 (lane-dense stores).
    Kpad = _round_up(K, 256) if K >= 256 else K
    Epad = _round_up(E, 256) if E >= 256 else _round_up(E, 128)
    out_bytes = jnp.dtype(out_dtype).itemsize

    # --- XLA glue: patchify (done in bf16 so the materialized rearranged copy
    # is half the bytes).
    # TODO(synk): an NHWC producer would make this reshape-only, and the
    # rearrangement could also be fused into the kernel (block over B*Hp with
    # Squeezed dims) to remove this extra HBM pass entirely.
    x_bf16 = x_nchw.astype(jnp.bfloat16)
    patches = x_bf16.reshape(B, C, Hp, P, Wp, P)
    patches = patches.transpose(0, 2, 4, 1, 3, 5).reshape(M, K)
    if Kpad != K:
        patches = jnp.pad(patches, ((0, 0), (0, Kpad - K)))

    # Conv weight (E, C, P, P) -> (Kpad, Epad) bf16, zero-padded; f32 bias row.
    w_mat = weight.reshape(E, K).T.astype(jnp.bfloat16)
    w_mat = jnp.pad(w_mat, ((0, Kpad - K), (0, Epad - E)))
    b_row = jnp.pad(bias.astype(jnp.float32), (0, Epad - E)).reshape(1, Epad)

    TM = _pick_tm(M)
    grid_m = pl.cdiv(M, TM)

    # VMEM budget: double-buffered patch rows + output, single-buffered weight
    # and bias.  Set the scoped limit explicitly (with headroom) so larger TM
    # never hits the 16 MiB default silently.
    vmem_est = (2 * TM * Kpad * 2 + 2 * TM * Epad * out_bytes
                + Kpad * Epad * 2 + Epad * 4)
    vmem_limit = int(min(max(2 * vmem_est, 32 << 20), 48 << 20))

    cost = pl.CostEstimate(
        flops=2 * M * Kpad * Epad,
        transcendentals=0,
        bytes_accessed=(M * Kpad * 2 + Kpad * Epad * 2 + Epad * 4
                        + M * Epad * out_bytes),
    )

    out_rows = pl.pallas_call(
        _patch_embed_kernel,
        out_shape=jax.ShapeDtypeStruct((M, Epad), out_dtype),
        grid_spec=pltpu.PrefetchScalarGridSpec(
            num_scalar_prefetch=0,
            grid=(grid_m,),
            in_specs=[
                # Patch rows: pipelined (double-buffered) along the grid.
                pl.BlockSpec((TM, Kpad), lambda i: (i, 0)),
                # Weight / bias: constant index map -> VMEM-resident, single
                # buffer (no second copy).
                pl.BlockSpec((Kpad, Epad), lambda i: (0, 0),
                             pipeline_mode=pl.Buffered(1)),
                pl.BlockSpec((1, Epad), lambda i: (0, 0),
                             pipeline_mode=pl.Buffered(1)),
            ],
            out_specs=pl.BlockSpec((TM, Epad), lambda i: (i, 0)),
        ),
        compiler_params=pltpu.CompilerParams(
            dimension_semantics=("parallel",),
            vmem_limit_bytes=vmem_limit,
        ),
        cost_estimate=cost,
    )(patches, w_mat, b_row)

    emb = out_rows[:, :E]                       # drop the lane padding (bf16)
    if channels_last:
        return emb.reshape(B, Hp * Wp, E)       # reshape-only, no HBM transpose
    # NCHW for torch-module API parity (transpose done in the bf16 dtype).
    return emb.reshape(B, Hp, Wp, E).transpose(0, 3, 1, 2)


if __name__ == "__main__":
    # Module config (matches PyTorch defaults): in_channels=3, patch_size=4, emb_size=48
    in_channels, patch_size, emb_size = 3, 4, 48
    B, H, W = 2, 16, 16

    key = jax.random.PRNGKey(0)
    kx, kw, kb = jax.random.split(key, 3)

    x = jax.random.normal(kx, (B, in_channels, H, W), dtype=jnp.float32)
    # Deterministic parameter init (PyTorch-like uniform scale).
    fan_in = in_channels * patch_size * patch_size
    bound = 1.0 / (fan_in ** 0.5)
    weight = jax.random.uniform(
        kw, (emb_size, in_channels, patch_size, patch_size),
        minval=-bound, maxval=bound, dtype=jnp.float32)
    bias = jax.random.uniform(kb, (emb_size,), minval=-bound, maxval=bound,
                              dtype=jnp.float32)

    out = patch_embedding(x, weight, bias, patch_size)
    out = jax.block_until_ready(out)

    # f32 reference conv; kernel uses bf16 operands/output with f32
    # accumulation, so compare with a bf16-appropriate tolerance.
    ref = jax.lax.conv_general_dilated(
        x, weight, window_strides=(patch_size, patch_size), padding="VALID",
        dimension_numbers=("NCHW", "OIHW", "NCHW"),
    ) + bias.reshape(1, emb_size, 1, 1)

    assert out.shape == (B, emb_size, H // patch_size, W // patch_size)
    assert out.dtype == jnp.bfloat16
    out_f32 = out.astype(jnp.float32)
    max_err = float(jnp.max(jnp.abs(out_f32 - ref)))
    assert jnp.allclose(out_f32, ref, atol=3e-2, rtol=3e-2), max_err
    print("KERNEL_OK")
</pallas_src>

<mosaic_0001>
module attributes {stable_mosaic.version = 11 : i64} {
  func.func @_patch_embed_kernel(%arg0: i32, %arg1: memref<16x48xbf16, #tpu.memory_space<vmem>>, %arg2: memref<48x128xbf16, #tpu.memory_space<vmem>>, %arg3: memref<1x128xf32, #tpu.memory_space<vmem>>, %arg4: memref<16x128xbf16, #tpu.memory_space<vmem>>) attributes {dimension_semantics = [#tpu.dimension_semantics<parallel>], iteration_bounds = array<i64: 2>, scalar_prefetch = 0 : i64, scratch_operands = 0 : i64, tpu.core_type = #tpu.core_type<tc>, window_params = [{transform_indices = @transform_0, window_bounds = array<i64: 16, 48>}, {pipeline_mode = #tpu.pipeline_mode<synchronous>, transform_indices = @transform_1, window_bounds = array<i64: 48, 128>}, {pipeline_mode = #tpu.pipeline_mode<synchronous>, transform_indices = @transform_2, window_bounds = array<i64: 1, 128>}, {transform_indices = @transform_3, window_bounds = array<i64: 16, 128>}]} {
    %c0 = arith.constant 0 : index
    %c0_0 = arith.constant 0 : index
    %0 = vector.load %arg1[%c0, %c0_0] : memref<16x48xbf16, #tpu.memory_space<vmem>>, vector<16x48xbf16>
    %c0_1 = arith.constant 0 : index
    %c0_2 = arith.constant 0 : index
    %1 = vector.load %arg2[%c0_1, %c0_2] : memref<48x128xbf16, #tpu.memory_space<vmem>>, vector<48x128xbf16>
    %cst = arith.constant dense<0.000000e+00> : vector<16x128xf32>
    %2 = tpu.matmul %0, %1, %cst {dimension_numbers = #tpu.dot_dimension_numbers<[1], [0], [0], [1], [0, 0, 1, 1], [], []>} : vector<16x48xbf16>, vector<48x128xbf16>, vector<16x128xf32> -> vector<16x128xf32>
    %c0_3 = arith.constant 0 : index
    %c0_4 = arith.constant 0 : index
    %3 = vector.load %arg3[%c0_3, %c0_4] : memref<1x128xf32, #tpu.memory_space<vmem>>, vector<1x128xf32>
    %4 = vector.broadcast %3 : vector<1x128xf32> to vector<16x128xf32>
    %5 = arith.addf %2, %4 : vector<16x128xf32>
    %6 = arith.truncf %5 : vector<16x128xf32> to vector<16x128xbf16>
    %c0_5 = arith.constant 0 : index
    %c0_6 = arith.constant 0 : index
    %7 = vector.load %arg4[%c0_5, %c0_6] : memref<16x128xbf16, #tpu.memory_space<vmem>>, vector<16x128xbf16>
    tpu.vector_store %arg4[%c0_5, %c0_6], %6 {strides = array<i32>} : memref<16x128xbf16, #tpu.memory_space<vmem>>, vector<16x128xbf16>,
    return
  }
  func.func @transform_0(%arg0: i32) -> (i32, i32) {
    %c0_i32 = arith.constant 0 : i32
    %c0_i32_0 = arith.constant 0 : i32
    return %arg0, %c0_i32 : i32, i32
  }
  func.func @transform_1(%arg0: i32) -> (i32, i32) {
    %c0_i32 = arith.constant 0 : i32
    %c0_i32_0 = arith.constant 0 : i32
    %c0_i32_1 = arith.constant 0 : i32
    return %c0_i32, %c0_i32_0 : i32, i32
  }
  func.func @transform_2(%arg0: i32) -> (i32, i32) {
    %c0_i32 = arith.constant 0 : i32
    %c0_i32_0 = arith.constant 0 : i32
    %c0_i32_1 = arith.constant 0 : i32
    return %c0_i32, %c0_i32_0 : i32, i32
  }
  func.func @transform_3(%arg0: i32) -> (i32, i32) {
    %c0_i32 = arith.constant 0 : i32
    %c0_i32_0 = arith.constant 0 : i32
    return %arg0, %c0_i32 : i32, i32
  }
}

</mosaic_0001>

<bundles_post_ra>
// kernel: tpu_custom_call.1
= control target key start
LH: loop header
LB: loop body
LE: loop exit
PB: predicated region body
PF: predicated region fallthrough
CT: control target
= control target key end

     0   :  { %8 = vsyncpa [#allocation3], 0  ;;  %s880_s0 = inlined_call_operand.hbm [shape: bf16[32,48], index: 0, kind: input, shape index: {}]   ;;  %s881_s1 = inlined_call_operand.hbm [shape: bf16[48,128], index: 1, kind: input, shape index: {}]   ;;  %s882_s2 = inlined_call_operand.vmem [shape: f32[1,128], index: 2, kind: input, shape index: {}]   ;;  %s883_s3 = inlined_call_operand.hbm [shape: bf16[32,128], index: 3, kind: output, shape index: {}]  }
   0x1   :  { %10 = vsyncpa [#allocation3 + $0x1], 0 }
   0x2   :  { %11 = vsyncpa [#allocation6], 0 }
   0x3   :  { %12 = vsyncpa [#allocation4], 0 }
   0x4   :  { %14 = vsyncpa [#allocation4 + $0x1], 0  ;;  %s670_s12 = smov 0   ;;  %s672_s13 = smov 0  }
   0x5   :  { %s674_s14 = smov 0   ;;  %s676_s15 = smov 0  }
   0x6 LB: > { %s691_s16 = sadd.s32 4294967295, %s639_s15   ;;  %s397_s17 = sadd.s32 4294967294, %s639_s15   ;;  %s639_s15 = sphi %s676_s15, %s903_s15   ;;  %s635_s14 = sphi %s674_s14, %s902_s14   ;;  %s631_s13 = sphi %s672_s13, %s901_s13   ;;  %s627_s12 = sphi %s670_s12, %s900_s12  }
   0x7   : > { %p40_p0 = scmp.ne.s32.totalorder %s631_s13, %s627_s12  ;;  %p884_p1 = scmp.eq.s32.totalorder %s691_s16, 0 }
   0x8   : > { %p112_p3 = scmp.eq.s32.totalorder %s397_s17, 1  ;;  %p398_p5 = scmp.ge.s32.totalorder %s639_s15, 1 }
   0x9   : > { %p700_p4 = por %p884_p1, %p40_p0  ;;  %p119_p7 = scmp.lt.s32.totalorder %s639_s15, 3 }
   0xa   : > { %p705_p6 = por %p112_p3, %p40_p0  ;;  %s641_s21 = smov [#allocation5]  }
   0xb   : > { %s887_s18 = scalar_select %p700_p4, 1, 0 }
   0xc   : > { %s888_s19 = scalar_select %p705_p6, 1, 0 }
   0xd   : > { %p710_p8 = pnand %p398_p5, %p119_p7  ;;  %s131_s22 = sshll.u32 %s641_s21, 4  ;;  %s714_s22 = int_to_ptr.vmem [resolvable:$true] %s131_s22 }
   0xe   : > { %s726_s24 = sadd.s32 1, %s639_s15   ;;  %s27_s25 = sadd.s32 1, %s635_s14 }
   0xf   : > { %s889_s20 = scalar_select %p710_p8, 1, 0 }
  0x10   : > { %p452_p9 = pneg %p710_p8  ;;  %s24_s26 = ssub.s32 %s639_s15, %s726_s24 }
  0x11   : > { %s511_s29 = scalar_lea.hbm %s881_s1, 384 }
  0x12   : > { %p721_p11 = pnand %p452_p9, %p884_p1  ;;  %p512_p12 = scmp.ne.s32.totalorder %s881_s1, %s511_s29 }
  0x13   : > { %p518_p5 = scmp.lt.u32.totalorder %s511_s29, %s881_s1 }
  0x14   : > { %p513_p13 = pneg %p721_p11 }
  0x16   : > { %p514_p0 = pnand %p513_p13, %p512_p12 }
  0x18   : > { %p515_p3 = pneg %p514_p0 }
  0x1a   : > { %p520_p7 = pnand %p518_p5, %p515_p3 }
  0x1c   : > { %523 = shalt.err (!%p520_p7)
}
  0x1d   : > { %s524_s7 = scalar_lea.vmem %s714_s22, 384  ;;  %p532_p2 = scmp.lt.s32.totalorder %s714_s22, %s714_s22 }
  0x1e   : > { %p525_p9 = scmp.ne.s32.totalorder %s714_s22, %s524_s7  ;;  %p533_p6 = scmp.lt.s32.totalorder %s524_s7, %s524_s7 }
  0x20   : > { %p527_p10 = pnand %p525_p9, %p513_p13  ;;  %p534_p4 = por %p533_p6, %p532_p2 }
  0x22   : > { %p528_p1 = pneg %p527_p10 }
  0x24   : > { %p535_p8 = pnand %p534_p4, %p528_p1 }
  0x26   : > { %538 = shalt.err (!%p535_p8)
}
  0x27   : > { %s642_s8 = smov 64   ;;  %s643_s9 = smov 4  }
  0x28   : > { %455 = dma.hbm_to_vmem [thread:$0]  (!%p721_p11), %s881_s1, 384, %s714_s22, [#allocation6], %s642_s8, %s642_s8, %s643_s9  }
  0x29   : > { %p25_p1 = scmp.eq.s32.totalorder %s24_s26, 0  ;;  %p34_p2 = scmp.ne.s32.totalorder %s635_s14, %s631_s13 }
  0x2a   : > { %p35_p4 = scmp.eq.s32.totalorder %s639_s15, 0  ;;  %p465_p6 = scmp.lt.s32.totalorder %s639_s15, 2 }
  0x2b   : > { %s760_s17 = scalar_select %p25_p1, %s635_s14, %s27_s25  }
  0x2c   : > { %p36_p8 = por %p35_p4, %p34_p2  ;;  %p891_p10 = scmp.eq.s32.totalorder %s691_s16, 1 }
  0x2d   : > { %s148_s23 = sand.u32 1, %s635_s14   ;;  %s421_s27 = sshll.u32 %s639_s15, 7 }
  0x2e   : > { %p764_p12 = por %p891_p10, %p34_p2  ;;  %s401_s28 = sshll.u32 %s148_s23, 3 }
  0x2f   : > { %s773_s4 = scalar_lea.hbm %s880_s0, %s421_s27  ;;  %s152_s22 = scalar_lea.vmem [#allocation2], %s401_s28 }
  0x30   : > { %s159_s25 = sshll.u32 %s152_s22, 4  ;;  %p775_p11 = pnand %p465_p6, %p36_p8  ;;  %s779_s25 = int_to_ptr.vmem [resolvable:$true] %s159_s25 }
  0x31   : > { %s781_s5 = scalar_lea.sflag [#allocation3], %s148_s23  ;;  %s539_s6 = scalar_lea.hbm %s773_s4, 128 }
  0x32   : > { %p540_p13 = scmp.ne.s32.totalorder %s773_s4, %s539_s6  ;;  %p541_p0 = pneg %p775_p11 }
  0x33   : > { %s544_s11 = scalar_lea.hbm %s880_s0, 256  ;;  %p545_p7 = scmp.lt.u32.totalorder %s773_s4, %s880_s0 }
  0x34   : > { %p542_p3 = pnand %p541_p0, %p540_p13  ;;  %p546_p9 = scmp.lt.u32.totalorder %s544_s11, %s539_s6 }
  0x35   : > { %p548_p2 = scmp.lt.u32.totalorder %s539_s6, %s773_s4 }
  0x36   : > { %p543_p5 = pneg %p542_p3  ;;  %p547_p1 = por %p546_p9, %p545_p7 }
  0x38   : > { %p549_p4 = por %p548_p2, %p547_p1 }
  0x3a   : > { %p550_p6 = pnand %p549_p4, %p543_p5 }
  0x3c   : > { %553 = shalt.err (!%p550_p6)
}
  0x3d   : > { %s554_s23 = scalar_lea.vmem %s779_s25, 128  ;;  %s644_s29 = smov [#allocation2]  }
  0x3e   : > { %p555_p8 = scmp.ne.s32.totalorder %s779_s25, %s554_s23  ;;  %s559_s30 = sshll.u32 %s644_s29, 4  ;;  %s560_s30 = int_to_ptr.vmem [resolvable:$false] %s559_s30 }
  0x3f   : > { %s561_s22 = scalar_lea.vmem %s560_s30, 256  ;;  %p562_p3 = scmp.lt.s32.totalorder %s779_s25, %s560_s30 }
  0x40   : > { %p557_p10 = pnand %p555_p8, %p541_p0  ;;  %p563_p7 = scmp.lt.s32.totalorder %s561_s22, %s554_s23 }
  0x42   : > { %p558_p13 = pneg %p557_p10  ;;  %p564_p9 = por %p563_p7, %p562_p3 }
  0x44   : > { %p565_p1 = pnand %p564_p9, %p558_p13 }
  0x46   : > { %568 = shalt.err (!%p565_p1)
}
  0x47   : > { %459 = dma.hbm_to_vmem [thread:$0]  (!%p775_p11), %s773_s4, 128, %s779_s25, %s781_s5, %s642_s8, %s642_s8, %s643_s9  }
  0x48   : > { %p894_p0 = scmp.ne.s32.totalorder %s889_s20, 0 }
  0x49   : > { %s815_s6 = sand.u32 (!%p894_p0), 1, %s631_s13   ;;  %p895_p5 = scmp.ne.s32.totalorder (!%p894_p0), %s887_s18, 0 }
  0x4a   : > { %171 = sbr.rel (%p894_p0) target bundleno = 331 (0x14b), region = 32  ;;  %s405_s7 = sshll.u32 (!%p894_p0), %s815_s6, 3 }
  0x4b   : > { %s174_s10 = scalar_lea.sflag (!%p894_p0), [#allocation3], %s815_s6  ;;  %s177_s11 = scalar_lea.vmem (!%p894_p0), [#allocation2], %s405_s7 }
  0x51   : > { %614 = dma.done.wait (%p895_p5), %s174_s10, 128  }
  0x52   : > { %616 = vsyncadd (%p895_p5), %s174_s10, 4294967168  ;;  %p896_p2 = scmp.eq.s32.totalorder %s691_s16, 0 }
  0x54   : > { %618 = dma.done.wait (%p896_p2), [#allocation6], 384   ;;  %p897_p11 = pmov %p896_p2 }
  0x55   : > { %v645_v0 = vmov 0.0   ;;  %vm646_vm0 = vmmov 0   ;;  %v507_v1 = vld [vmem:[#allocation5] sm:$0xff]   ;;  %v508_v2 = vld [vmem:[#allocation5 + $0x8] sm:$0xff]   ;;  %v509_v3 = vld [vmem:[#allocation5 + $0x10] sm:$0xff]   ;;  %vm245_vm1 = vcmask 392192  }
  0x56   : > { %620 = vsyncadd (%p897_p11), [#allocation6], 4294966912  ;;  %434 = vmatprep.subr.bf16.mxu0 %v645_v0  ;;  %440 = vmatprep.mubr.msk.bf16.mxu0 %vm646_vm0, %v645_v0  ;;  %v510_v4 = vld [vmem:[%s177_s11] sm:$0xff]   ;;  %s203_s8 = scalar_lea.vmem [#allocation7], %s405_s7  ;;  %s424_s4 = sshll.u32 %s691_s16, 7 }
  0x57   : > { %435 = vmatpush3.bf16.msra.mxu0 %v507_v1  ;;  %v408_v5 = vld [vmem:[%s882_s2] ss:$0 sm:$0xff]  ;;  %s314_s9 = sshll.u32 %s203_s8, 4  ;;  %s836_s5 = scalar_lea.hbm %s883_s3, %s424_s4  ;;  %s831_s9 = int_to_ptr.vmem [resolvable:$true] %s314_s9 }
  0x58   : > { %436 = vmatprep.subr.bf16.mxu0 %v645_v0  ;;  %s301_s27 = scalar_lea.sflag [#allocation4], %s815_s6  ;;  %s569_s28 = scalar_lea.vmem %s831_s9, 128 }
  0x59   : > { %p570_p4 = scmp.ne.s32.totalorder %s831_s9, %s569_s28  ;;  %s647_s16 = smov [#allocation7]  }
  0x5a   : > { %s573_s23 = sshll.u32 %s647_s16, 4  ;;  %s574_s23 = int_to_ptr.vmem [resolvable:$false] %s573_s23 }
  0x5b   : > { %437 = vmatpush3.bf16.msra.mxu0 %v508_v2  ;;  %p571_p6 = pnand %p570_p4, %p764_p12  ;;  %s575_s29 = scalar_lea.vmem %s574_s23, 256 }
  0x5c   : > { %438 = vmatprep.subr.bf16.mxu0 %v645_v0  ;;  %p576_p10 = scmp.lt.s32.totalorder %s831_s9, %s574_s23  ;;  %p577_p13 = scmp.lt.s32.totalorder %s575_s29, %s569_s28 }
  0x5d   : > { %p572_p8 = pneg %p571_p6 }
  0x5e   : > { %p578_p3 = por %p577_p13, %p576_p10 }
  0x5f   : > { %439 = vmatpush3.bf16.msra.mxu0 %v509_v3 }
  0x60   : > { %p579_p7 = pnand %p578_p3, %p572_p8 }
  0x62   : > { %441 = vmatmul.mubr.msk.bf16.vlgmr.msra.gmra.mrb[0].mxu0 %vm245_vm1, %v510_v4 }
 0x135   : > { %v283_v6 = vpop.f32.mrb[0].mxu0 }
 0x136   : > { %v442_v7 = vpop.f32.mrb[1].mxu0  ;;  %v284_v9 = vadd.f32 %v408_v5, %v283_v6 }
 0x137   : > { %v286_v8 = vpop.f32.mrb[2].mxu0 }
 0x138   : > { %v287_v10 = vadd.f32 %v408_v5, %v286_v8  ;;  %v443_v11 = vpop.f32.mrb[3].mxu0 }
 0x13a   : > { %v428_v12 = vpack.c.bf16 %v287_v10, %v284_v9 }
 0x13c   : > { %429 = vst [vmem:[%s203_s8] sm:$0xff] %v428_v12  }
 0x13d   : > { %582 = shalt.err (!%p579_p7)
}
 0x13e   : > { %s583_s30 = scalar_lea.hbm %s836_s5, 128  ;;  %s587_s10 = scalar_lea.hbm %s883_s3, 256 }
 0x13f   : > { %p584_p9 = scmp.ne.s32.totalorder %s836_s5, %s583_s30  ;;  %p588_p5 = scmp.lt.u32.totalorder %s836_s5, %s883_s3 }
 0x140   : > { %p589_p2 = scmp.lt.u32.totalorder %s587_s10, %s583_s30  ;;  %p591_p4 = scmp.lt.u32.totalorder %s583_s30, %s836_s5 }
 0x141   : > { %p585_p1 = pnand %p584_p9, %p764_p12 }
 0x142   : > { %p590_p11 = por %p589_p2, %p588_p5 }
 0x143   : > { %p586_p0 = pneg %p585_p1 }
 0x144   : > { %p592_p6 = por %p591_p4, %p590_p11 }
 0x146   : > { %p593_p8 = pnand %p592_p6, %p586_p0 }
 0x148   : > { %596 = shalt.err (!%p593_p8)
}
 0x149   : > { %s648_s20 = smov 64   ;;  %s649_s8 = smov 4  }
 0x14a   : > { %450 = dma.vmem_to_hbm [thread:$0]  (%p764_p12), %s831_s9, 128, %s836_s5, %s301_s27, %s648_s20, %s648_s20, %s649_s8  }
 0x14b PF: > { %s329_s4 = sand.u32 1, %s627_s12   ;;  %p898_p10 = scmp.ne.s32.totalorder %s888_s19, 0 }
 0x14c   : > { %p899_p13 = scmp.ge.s32.totalorder %s639_s15, 2  ;;  %s330_s25 = scalar_lea.sflag [#allocation4], %s329_s4 }
 0x14e   : > { %p461_p3 = pnand %p899_p13, %p898_p10 }
 0x150   : > { %622 = dma.done.wait (!%p461_p3), %s330_s25, 128  }
 0x151   : > { %624 = vsyncadd (!%p461_p3), %s330_s25, 4294967168  ;;  %p17_p7 = scmp.ge.s32.totalorder %s726_s24, 4   ;;  %s900_s12 = smov %s631_s13 }
 0x152   : > { %s901_s13 = smov %s635_s14  ;;  %s902_s14 = smov %s760_s17 }
 0x153   : > { %s903_s15 = smov %s726_s24  ;;  %19 = sbr.rel (!%p17_p7) target bundleno = 6 (0x6), region = 81 }
 0x15a   :  { %335 = vsyncpa [#allocation3], 1 }
 0x15b   :  { %337 = vsyncpa [#allocation3 + $0x1], 1 }
 0x15c   :  { %338 = vsyncpa [#allocation6], 1 }
 0x15d   :  { %339 = vsyncpa [#allocation4], 1 }
 0x15e   :  { %341 = vsyncpa [#allocation4 + $0x1], 1 }

</bundles_post_ra>
